<compile_context>
chip_gen: v7x
topology: tpu7x:2x2x1
jax: 0.10.0
libtpu: 0.0.40
codegen_flags: <defaults>
</compile_context>

<pallas_src>
import functools

import jax
import jax.numpy as jnp
from jax.experimental import pallas as pl
from jax.experimental.pallas import tpu as pltpu


def _round_up(x, m):
    return ((x + m - 1) // m) * m


def _round_down(x, m):
    return (x // m) * m


def _linear_vpu_kernel(x_ref, w_ref, o_ref, *, k_dim):
    """o = x @ w with a tiny contraction dim: K broadcast-FMAs (VPU), f32 acc."""
    x = x_ref[...].astype(jnp.float32)
    w = w_ref[...].astype(jnp.float32)
    acc = x[:, 0:1] * w[0:1, :]
    for k in range(1, k_dim):            # k_dim <= 6*r <= 24; fully unrolled
        acc = acc + x[:, k:k + 1] * w[k:k + 1, :]
    o_ref[...] = acc.astype(o_ref.dtype)


def time_feature_embedding(x, weight_t, *, tm=None):
    """TimeFeatureEmbedding forward.

    x:        (B, S, d_inp) time features
    weight_t: (d_inp, d_model)  == torch nn.Linear weight transposed (weight.T)
    returns:  (B, S, d_model)   == x @ weight_t  (no bias)
    """
    B, S, d_inp = x.shape
    d_model = weight_t.shape[1]
    M = B * S
    dtype = x.dtype
    itemsize = jnp.dtype(dtype).itemsize

    # ---- lane-dense output packing (free row-major views) -------------------
    if d_model < 128 and 128 % d_model == 0:
        r = 128 // d_model
    else:
        r = 1

    # One small pad: M -> multiple of 8*r so that (a) the packing reshape is
    # exact and (b) the packed row count is a multiple of 8 sublanes.  Ragged
    # last *tiles* are handled by the grid itself (no further padding).
    m_pad = _round_up(M, 8 * r)
    x2d = x.reshape(M, d_inp)
    if m_pad != M:
        x2d = jnp.pad(x2d, ((0, m_pad - M), (0, 0)))

    if r > 1:
        m_rows = m_pad // r
        x_work = x2d.reshape(m_rows, r * d_inp)
        # block-diagonal weight: kron(I_r, W) -> (r*d_inp, r*d_model == 128)
        w_work = jnp.kron(jnp.eye(r, dtype=weight_t.dtype), weight_t)
    else:
        m_rows = m_pad
        x_work = x2d
        w_work = weight_t
    k_dim, n_dim = w_work.shape

    # ---- row tile: largest multiple of 8 fitting a ~10 MiB double-buffer ----
    bytes_per_row = itemsize * (k_dim + n_dim)
    vmem_cap = max(8, _round_down((10 << 20) // (2 * bytes_per_row), 8))
    tm_req = 4096 if tm is None else max(8, _round_down(int(tm), 8))
    tm_eff = min(tm_req, vmem_cap, m_rows)
    grid = (pl.cdiv(m_rows, tm_eff),)

    cost = pl.CostEstimate(
        flops=2 * M * d_inp * d_model,
        transcendentals=0,
        bytes_accessed=itemsize * (M * d_inp + d_inp * d_model + M * d_model),
    )

    out_work = pl.pallas_call(
        functools.partial(_linear_vpu_kernel, k_dim=k_dim),
        out_shape=jax.ShapeDtypeStruct((m_rows, n_dim), dtype),
        grid_spec=pltpu.PrefetchScalarGridSpec(
            num_scalar_prefetch=0,
            grid=grid,
            in_specs=[
                pl.BlockSpec((tm_eff, k_dim), lambda i: (i, 0)),
                pl.BlockSpec((k_dim, n_dim), lambda i: (0, 0)),  # weight resident
            ],
            out_specs=pl.BlockSpec((tm_eff, n_dim), lambda i: (i, 0)),
        ),
        compiler_params=pltpu.CompilerParams(
            dimension_semantics=("parallel",),
        ),
        cost_estimate=cost,
    )(x_work, w_work)

    # ---- unpack (free view + slice) ------------------------------------------
    out2d = out_work.reshape(m_pad, d_model)[:M]
    return out2d.reshape(B, S, d_model)


def _check(B, S, d_inp, d_model, key, tm=None):
    kx, kw = jax.random.split(key)
    # nn.Linear weight layout is (d_model, d_inp); kernel takes its transpose.
    w_torch = jax.random.normal(kw, (d_model, d_inp), dtype=jnp.float32) * 0.1
    x = jax.random.normal(kx, (B, S, d_inp), dtype=jnp.float32)
    out = jax.block_until_ready(time_feature_embedding(x, w_torch.T, tm=tm))
    ref = jnp.einsum("bsi,oi->bso", x, w_torch)
    assert out.shape == (B, S, d_model), (out.shape, (B, S, d_model))
    assert jnp.allclose(out, ref, atol=1e-5, rtol=1e-5), float(
        jnp.max(jnp.abs(out - ref)))


if __name__ == "__main__":
    key = jax.random.PRNGKey(0)
    k0, k1, k2, k3 = jax.random.split(key, 4)

    # Module config: freq='h' -> d_inp = 4; small d_model = 32 (demo shapes).
    _check(B=2, S=8, d_inp=4, d_model=32, key=k0)
    # M not divisible by the lane-packing factor (exercises the row pad).
    _check(B=3, S=5, d_inp=4, d_model=32, key=k1)
    # Larger M with a forced small tile (exercises multi-step ragged grid).
    _check(B=8, S=600, d_inp=4, d_model=32, key=k2, tm=256)
    # d_model >= 128 path (no packing, resident (d_inp, d_model) weight), freq='t'.
    _check(B=2, S=8, d_inp=5, d_model=128, key=k3)

    print("KERNEL_OK")
</pallas_src>

<mosaic_0001>
module attributes {stable_mosaic.version = 11 : i64} {
  func.func @_linear_vpu_kernel(%arg0: i32, %arg1: memref<8x16xf32, #tpu.memory_space<vmem>>, %arg2: memref<16x128xf32, #tpu.memory_space<vmem>>, %arg3: memref<8x128xf32, #tpu.memory_space<vmem>>) attributes {dimension_semantics = [#tpu.dimension_semantics<parallel>], iteration_bounds = array<i64: 1>, scalar_prefetch = 0 : i64, scratch_operands = 0 : i64, tpu.core_type = #tpu.core_type<tc>, window_params = [{transform_indices = @transform_0, window_bounds = array<i64: 8, 16>}, {pipeline_mode = #tpu.pipeline_mode<synchronous>, transform_indices = @transform_1, window_bounds = array<i64: 16, 128>}, {transform_indices = @transform_2, window_bounds = array<i64: 8, 128>}]} {
    %c0 = arith.constant 0 : index
    %c0_0 = arith.constant 0 : index
    %0 = vector.load %arg1[%c0, %c0_0] : memref<8x16xf32, #tpu.memory_space<vmem>>, vector<8x16xf32>
    %c0_1 = arith.constant 0 : index
    %c0_2 = arith.constant 0 : index
    %1 = vector.load %arg2[%c0_1, %c0_2] : memref<16x128xf32, #tpu.memory_space<vmem>>, vector<16x128xf32>
    %2 = vector.extract_strided_slice %0 {offsets = [0, 0], sizes = [8, 1], strides = [1, 1]} : vector<8x16xf32> to vector<8x1xf32>
    %3 = vector.extract_strided_slice %1 {offsets = [0, 0], sizes = [1, 128], strides = [1, 1]} : vector<16x128xf32> to vector<1x128xf32>
    %4 = vector.broadcast %2 : vector<8x1xf32> to vector<8x128xf32>
    %5 = vector.broadcast %3 : vector<1x128xf32> to vector<8x128xf32>
    %6 = arith.mulf %4, %5 : vector<8x128xf32>
    %7 = vector.extract_strided_slice %0 {offsets = [0, 1], sizes = [8, 1], strides = [1, 1]} : vector<8x16xf32> to vector<8x1xf32>
    %8 = vector.extract_strided_slice %1 {offsets = [1, 0], sizes = [1, 128], strides = [1, 1]} : vector<16x128xf32> to vector<1x128xf32>
    %9 = vector.broadcast %7 : vector<8x1xf32> to vector<8x128xf32>
    %10 = vector.broadcast %8 : vector<1x128xf32> to vector<8x128xf32>
    %11 = arith.mulf %9, %10 : vector<8x128xf32>
    %12 = arith.addf %6, %11 : vector<8x128xf32>
    %13 = vector.extract_strided_slice %0 {offsets = [0, 2], sizes = [8, 1], strides = [1, 1]} : vector<8x16xf32> to vector<8x1xf32>
    %14 = vector.extract_strided_slice %1 {offsets = [2, 0], sizes = [1, 128], strides = [1, 1]} : vector<16x128xf32> to vector<1x128xf32>
    %15 = vector.broadcast %13 : vector<8x1xf32> to vector<8x128xf32>
    %16 = vector.broadcast %14 : vector<1x128xf32> to vector<8x128xf32>
    %17 = arith.mulf %15, %16 : vector<8x128xf32>
    %18 = arith.addf %12, %17 : vector<8x128xf32>
    %19 = vector.extract_strided_slice %0 {offsets = [0, 3], sizes = [8, 1], strides = [1, 1]} : vector<8x16xf32> to vector<8x1xf32>
    %20 = vector.extract_strided_slice %1 {offsets = [3, 0], sizes = [1, 128], strides = [1, 1]} : vector<16x128xf32> to vector<1x128xf32>
    %21 = vector.broadcast %19 : vector<8x1xf32> to vector<8x128xf32>
    %22 = vector.broadcast %20 : vector<1x128xf32> to vector<8x128xf32>
    %23 = arith.mulf %21, %22 : vector<8x128xf32>
    %24 = arith.addf %18, %23 : vector<8x128xf32>
    %25 = vector.extract_strided_slice %0 {offsets = [0, 4], sizes = [8, 1], strides = [1, 1]} : vector<8x16xf32> to vector<8x1xf32>
    %26 = vector.extract_strided_slice %1 {offsets = [4, 0], sizes = [1, 128], strides = [1, 1]} : vector<16x128xf32> to vector<1x128xf32>
    %27 = vector.broadcast %25 : vector<8x1xf32> to vector<8x128xf32>
    %28 = vector.broadcast %26 : vector<1x128xf32> to vector<8x128xf32>
    %29 = arith.mulf %27, %28 : vector<8x128xf32>
    %30 = arith.addf %24, %29 : vector<8x128xf32>
    %31 = vector.extract_strided_slice %0 {offsets = [0, 5], sizes = [8, 1], strides = [1, 1]} : vector<8x16xf32> to vector<8x1xf32>
    %32 = vector.extract_strided_slice %1 {offsets = [5, 0], sizes = [1, 128], strides = [1, 1]} : vector<16x128xf32> to vector<1x128xf32>
    %33 = vector.broadcast %31 : vector<8x1xf32> to vector<8x128xf32>
    %34 = vector.broadcast %32 : vector<1x128xf32> to vector<8x128xf32>
    %35 = arith.mulf %33, %34 : vector<8x128xf32>
    %36 = arith.addf %30, %35 : vector<8x128xf32>
    %37 = vector.extract_strided_slice %0 {offsets = [0, 6], sizes = [8, 1], strides = [1, 1]} : vector<8x16xf32> to vector<8x1xf32>
    %38 = vector.extract_strided_slice %1 {offsets = [6, 0], sizes = [1, 128], strides = [1, 1]} : vector<16x128xf32> to vector<1x128xf32>
    %39 = vector.broadcast %37 : vector<8x1xf32> to vector<8x128xf32>
    %40 = vector.broadcast %38 : vector<1x128xf32> to vector<8x128xf32>
    %41 = arith.mulf %39, %40 : vector<8x128xf32>
    %42 = arith.addf %36, %41 : vector<8x128xf32>
    %43 = vector.extract_strided_slice %0 {offsets = [0, 7], sizes = [8, 1], strides = [1, 1]} : vector<8x16xf32> to vector<8x1xf32>
    %44 = vector.extract_strided_slice %1 {offsets = [7, 0], sizes = [1, 128], strides = [1, 1]} : vector<16x128xf32> to vector<1x128xf32>
    %45 = vector.broadcast %43 : vector<8x1xf32> to vector<8x128xf32>
    %46 = vector.broadcast %44 : vector<1x128xf32> to vector<8x128xf32>
    %47 = arith.mulf %45, %46 : vector<8x128xf32>
    %48 = arith.addf %42, %47 : vector<8x128xf32>
    %49 = vector.extract_strided_slice %0 {offsets = [0, 8], sizes = [8, 1], strides = [1, 1]} : vector<8x16xf32> to vector<8x1xf32>
    %50 = vector.extract_strided_slice %1 {offsets = [8, 0], sizes = [1, 128], strides = [1, 1]} : vector<16x128xf32> to vector<1x128xf32>
    %51 = vector.broadcast %49 : vector<8x1xf32> to vector<8x128xf32>
    %52 = vector.broadcast %50 : vector<1x128xf32> to vector<8x128xf32>
    %53 = arith.mulf %51, %52 : vector<8x128xf32>
    %54 = arith.addf %48, %53 : vector<8x128xf32>
    %55 = vector.extract_strided_slice %0 {offsets = [0, 9], sizes = [8, 1], strides = [1, 1]} : vector<8x16xf32> to vector<8x1xf32>
    %56 = vector.extract_strided_slice %1 {offsets = [9, 0], sizes = [1, 128], strides = [1, 1]} : vector<16x128xf32> to vector<1x128xf32>
    %57 = vector.broadcast %55 : vector<8x1xf32> to vector<8x128xf32>
    %58 = vector.broadcast %56 : vector<1x128xf32> to vector<8x128xf32>
    %59 = arith.mulf %57, %58 : vector<8x128xf32>
    %60 = arith.addf %54, %59 : vector<8x128xf32>
    %61 = vector.extract_strided_slice %0 {offsets = [0, 10], sizes = [8, 1], strides = [1, 1]} : vector<8x16xf32> to vector<8x1xf32>
    %62 = vector.extract_strided_slice %1 {offsets = [10, 0], sizes = [1, 128], strides = [1, 1]} : vector<16x128xf32> to vector<1x128xf32>
    %63 = vector.broadcast %61 : vector<8x1xf32> to vector<8x128xf32>
    %64 = vector.broadcast %62 : vector<1x128xf32> to vector<8x128xf32>
    %65 = arith.mulf %63, %64 : vector<8x128xf32>
    %66 = arith.addf %60, %65 : vector<8x128xf32>
    %67 = vector.extract_strided_slice %0 {offsets = [0, 11], sizes = [8, 1], strides = [1, 1]} : vector<8x16xf32> to vector<8x1xf32>
    %68 = vector.extract_strided_slice %1 {offsets = [11, 0], sizes = [1, 128], strides = [1, 1]} : vector<16x128xf32> to vector<1x128xf32>
    %69 = vector.broadcast %67 : vector<8x1xf32> to vector<8x128xf32>
    %70 = vector.broadcast %68 : vector<1x128xf32> to vector<8x128xf32>
    %71 = arith.mulf %69, %70 : vector<8x128xf32>
    %72 = arith.addf %66, %71 : vector<8x128xf32>
    %73 = vector.extract_strided_slice %0 {offsets = [0, 12], sizes = [8, 1], strides = [1, 1]} : vector<8x16xf32> to vector<8x1xf32>
    %74 = vector.extract_strided_slice %1 {offsets = [12, 0], sizes = [1, 128], strides = [1, 1]} : vector<16x128xf32> to vector<1x128xf32>
    %75 = vector.broadcast %73 : vector<8x1xf32> to vector<8x128xf32>
    %76 = vector.broadcast %74 : vector<1x128xf32> to vector<8x128xf32>
    %77 = arith.mulf %75, %76 : vector<8x128xf32>
    %78 = arith.addf %72, %77 : vector<8x128xf32>
    %79 = vector.extract_strided_slice %0 {offsets = [0, 13], sizes = [8, 1], strides = [1, 1]} : vector<8x16xf32> to vector<8x1xf32>
    %80 = vector.extract_strided_slice %1 {offsets = [13, 0], sizes = [1, 128], strides = [1, 1]} : vector<16x128xf32> to vector<1x128xf32>
    %81 = vector.broadcast %79 : vector<8x1xf32> to vector<8x128xf32>
    %82 = vector.broadcast %80 : vector<1x128xf32> to vector<8x128xf32>
    %83 = arith.mulf %81, %82 : vector<8x128xf32>
    %84 = arith.addf %78, %83 : vector<8x128xf32>
    %85 = vector.extract_strided_slice %0 {offsets = [0, 14], sizes = [8, 1], strides = [1, 1]} : vector<8x16xf32> to vector<8x1xf32>
    %86 = vector.extract_strided_slice %1 {offsets = [14, 0], sizes = [1, 128], strides = [1, 1]} : vector<16x128xf32> to vector<1x128xf32>
    %87 = vector.broadcast %85 : vector<8x1xf32> to vector<8x128xf32>
    %88 = vector.broadcast %86 : vector<1x128xf32> to vector<8x128xf32>
    %89 = arith.mulf %87, %88 : vector<8x128xf32>
    %90 = arith.addf %84, %89 : vector<8x128xf32>
    %91 = vector.extract_strided_slice %0 {offsets = [0, 15], sizes = [8, 1], strides = [1, 1]} : vector<8x16xf32> to vector<8x1xf32>
    %92 = vector.extract_strided_slice %1 {offsets = [15, 0], sizes = [1, 128], strides = [1, 1]} : vector<16x128xf32> to vector<1x128xf32>
    %93 = vector.broadcast %91 : vector<8x1xf32> to vector<8x128xf32>
    %94 = vector.broadcast %92 : vector<1x128xf32> to vector<8x128xf32>
    %95 = arith.mulf %93, %94 : vector<8x128xf32>
    %96 = arith.addf %90, %95 : vector<8x128xf32>
    %c0_3 = arith.constant 0 : index
    %c0_4 = arith.constant 0 : index
    %97 = vector.load %arg3[%c0_3, %c0_4] : memref<8x128xf32, #tpu.memory_space<vmem>>, vector<8x128xf32>
    tpu.vector_store %arg3[%c0_3, %c0_4], %96 {strides = array<i32>} : memref<8x128xf32, #tpu.memory_space<vmem>>, vector<8x128xf32>,
    return
  }
  func.func @transform_0(%arg0: i32) -> (i32, i32) {
    %c0_i32 = arith.constant 0 : i32
    %c0_i32_0 = arith.constant 0 : i32
    return %arg0, %c0_i32 : i32, i32
  }
  func.func @transform_1(%arg0: i32) -> (i32, i32) {
    %c0_i32 = arith.constant 0 : i32
    %c0_i32_0 = arith.constant 0 : i32
    %c0_i32_1 = arith.constant 0 : i32
    return %c0_i32, %c0_i32_0 : i32, i32
  }
  func.func @transform_2(%arg0: i32) -> (i32, i32) {
    %c0_i32 = arith.constant 0 : i32
    %c0_i32_0 = arith.constant 0 : i32
    return %arg0, %c0_i32 : i32, i32
  }
}

</mosaic_0001>

<bundles_post_ra>
// kernel: tpu_custom_call.1
= control target key start
LH: loop header
LB: loop body
LE: loop exit
PB: predicated region body
PF: predicated region fallthrough
CT: control target
= control target key end

     0   :  { %7 = vsyncpa [#allocation3], 0  ;;  %s417_s0 = inlined_call_operand.hbm [shape: f32[8,16], index: 0, kind: input, shape index: {}]   ;;  %s418_s1 = inlined_call_operand.hbm [shape: f32[16,128], index: 1, kind: input, shape index: {}]   ;;  %s419_s2 = inlined_call_operand.hbm [shape: f32[8,128], index: 2, kind: output, shape index: {}]  }
   0x1   :  { %8 = vsyncpa [#allocation6], 0 }
   0x2   :  { %9 = vsyncpa [#allocation4], 0  ;;  %s328_s9 = smov [#allocation2]   ;;  %s329_s11 = smov [#allocation5]  }
   0x3   :  { %s16_s10 = sshll.u32 %s328_s9, 4  ;;  %s25_s12 = sshll.u32 %s329_s11, 4  ;;  %s17_s10 = int_to_ptr.vmem [resolvable:$true] %s16_s10  ;;  %s364_s12 = int_to_ptr.vmem [resolvable:$true] %s25_s12 }
   0x4   :  { %s256_s15 = scalar_lea.hbm %s417_s0, 128 }
   0x5   :  { %p257_p0 = scmp.ne.s32.totalorder %s417_s0, %s256_s15  ;;  %p260_p1 = scmp.lt.u32.totalorder %s256_s15, %s417_s0 }
   0x7   :  { %p262_p2 = pnand %p260_p1, %p257_p0 }
   0x9   :  { %265 = shalt.err (!%p262_p2)
}
   0xa   :  { %s266_s20 = scalar_lea.vmem %s17_s10, 128  ;;  %p271_p4 = scmp.lt.s32.totalorder %s17_s10, %s17_s10 }
   0xb   :  { %p267_p3 = scmp.ne.s32.totalorder %s17_s10, %s266_s20  ;;  %p272_p5 = scmp.lt.s32.totalorder %s266_s20, %s266_s20 }
   0xd   :  { %p273_p6 = por %p272_p5, %p271_p4 }
   0xf   :  { %p274_p7 = pnand %p273_p6, %p267_p3 }
  0x11   :  { %277 = shalt.err (!%p274_p7)
}
  0x12   :  { %19 = dma.hbm_to_vmem [thread:$0]  %s417_s0, 128, %s17_s10, [#allocation3]  }
  0x13   :  { %s278_s25 = scalar_lea.hbm %s418_s1, 256 }
  0x14   :  { %p279_p8 = scmp.ne.s32.totalorder %s418_s1, %s278_s25  ;;  %p282_p9 = scmp.lt.u32.totalorder %s278_s25, %s418_s1 }
  0x16   :  { %p284_p10 = pnand %p282_p9, %p279_p8 }
  0x18   :  { %287 = shalt.err (!%p284_p10)
}
  0x19   :  { %s288_s30 = scalar_lea.vmem %s364_s12, 256  ;;  %p293_p12 = scmp.lt.s32.totalorder %s364_s12, %s364_s12 }
  0x1a   :  { %p289_p11 = scmp.ne.s32.totalorder %s364_s12, %s288_s30  ;;  %p294_p13 = scmp.lt.s32.totalorder %s288_s30, %s288_s30 }
  0x1c   :  { %p295_p0 = por %p294_p13, %p293_p12 }
  0x1e   :  { %p296_p1 = pnand %p295_p0, %p289_p11 }
  0x20   :  { %299 = shalt.err (!%p296_p1)
}
  0x21   :  { %s330_s0 = smov 128   ;;  %s331_s3 = smov 8  }
  0x22   :  { %31 = dma.hbm_to_vmem [thread:$0]  %s418_s1, 256, %s364_s12, [#allocation6], %s330_s0, %s330_s0, %s331_s3  }
  0x23   :  { %322 = dma.done.wait [#allocation3], 128  }
  0x24   :  { %323 = vsyncadd [#allocation3], 4294967168 }
  0x25   :  { %324 = dma.done.wait [#allocation6], 256  }
  0x26   :  { %325 = vsyncadd [#allocation6], 4294967040  ;;  %v332_v0 = vmov 2   ;;  %v333_v1 = vmov 0   ;;  %v38_v2 = vld [vmem:[#allocation2] sm:$0xff]  ;;  %v334_v3 = vmov 3   ;;  %v46_v17 = vlaneseq }
  0x27   :  { %241 = vset.pattern.permute.xlu1 %v332_v0  ;;  %239 = vset.pattern.permute.xlu0 %v333_v1  ;;  %v335_v4 = vmov 1   ;;  %v336_v5 = vmov 4   ;;  %v337_v6 = vmov 5   ;;  %v338_v7 = vmov 6   ;;  %v39_v21 = vld [vmem:[#allocation5] sm:$0xff]  ;;  %v40_v52 = vld [vmem:[#allocation5 + $0x8] sm:$0xff] }
  0x28   :  { %62 = vperm.xlu1 %241, %v38_v2   ;;  %43 = vperm.xlu0 %239, %v38_v2   ;;  %v339_v8 = vmov 8   ;;  %v340_v9 = vmov 7   ;;  %v341_v10 = vmov 11   ;;  %v342_v11 = vmov 9   ;;  %s348_s1 = smov [#allocation7]  }
  0x29   :  { %v343_v12 = vmov 14   ;;  %v344_v13 = vmov 10   ;;  %v345_v14 = vmov 15   ;;  %v346_v15 = vmov 12   ;;  %s208_s6 = sshll.u32 %s348_s1, 4  ;;  %s209_s6 = int_to_ptr.vmem [resolvable:$true] %s208_s6 }
  0x2a   :  { %v347_v16 = vmov 13   ;;  %v395_v18 = vshrl.u32 %v46_v17, 7  ;;  %s300_s7 = scalar_lea.vmem %s209_s6, 128  ;;  %p305_p3 = scmp.lt.s32.totalorder %s209_s6, %s209_s6 }
  0x2b   :  { %p301_p2 = scmp.ne.s32.totalorder %s209_s6, %s300_s7  ;;  %p306_p4 = scmp.lt.s32.totalorder %s300_s7, %s300_s7 }
  0x2c   :  { %242 = vset.pattern.permute.xlu1 %v334_v3  ;;  %240 = vset.pattern.permute.xlu0 %v335_v4  ;;  %v48_v19 = vsub.s32 0, %v395_v18  ;;  %v57_v20 = vsub.s32 1, %v395_v18  ;;  %v67_v22 = vsub.s32 2, %v395_v18  ;;  %v77_v26 = vsub.s32 3, %v395_v18 }
  0x2d   :  { %72 = vperm.xlu1 %242, %v38_v2   ;;  %52 = vperm.xlu0 %240, %v38_v2   ;;  %v87_v28 = vsub.s32 4, %v395_v18  ;;  %v97_v33 = vsub.s32 5, %v395_v18  ;;  %v107_v40 = vsub.s32 6, %v395_v18  ;;  %v117_v49 = vsub.s32 7, %v395_v18  ;;  %p307_p5 = por %p306_p4, %p305_p3 }
  0x2e   :  { %v49_v24 = vrot.slane %v39_v21, %v48_v19  ;;  %v58_v27 = vrot.slane %v39_v21, %v57_v20  ;;  %v68_v29 = vrot.slane %v39_v21, %v67_v22  ;;  %v78_v34 = vrot.slane %v39_v21, %v77_v26 }
  0x2f   :  { %v88_v36 = vrot.slane %v39_v21, %v87_v28  ;;  %v98_v39 = vrot.slane %v39_v21, %v97_v33  ;;  %v108_v48 = vrot.slane %v39_v21, %v107_v40  ;;  %v118_v55 = vrot.slane %v39_v21, %v117_v49  ;;  %p308_p6 = pnand %p307_p5, %p301_p2 }
  0x30   :  { %v128_v56 = vrot.slane %v40_v52, %v48_v19  ;;  %v138_v63 = vrot.slane %v40_v52, %v57_v20  ;;  %v148_v3 = vrot.slane %v40_v52, %v67_v22  ;;  %v158_v4 = vrot.slane %v40_v52, %v77_v26 }
  0x31   :  { %243 = vset.pattern.permute.xlu1 %v336_v5  ;;  %244 = vset.pattern.permute.xlu0 %v337_v6 }
  0x32   :  { %82 = vperm.xlu1 %243, %v38_v2   ;;  %92 = vperm.xlu0 %244, %v38_v2  }
  0x36   :  { %245 = vset.pattern.permute.xlu1 %v338_v7  ;;  %247 = vset.pattern.permute.xlu0 %v339_v8 }
  0x37   :  { %102 = vperm.xlu1 %245, %v38_v2   ;;  %122 = vperm.xlu0 %247, %v38_v2  }
  0x3b   :  { %246 = vset.pattern.permute.xlu1 %v340_v9  ;;  %250 = vset.pattern.permute.xlu0 %v341_v10 }
  0x3c   :  { %112 = vperm.xlu1 %246, %v38_v2   ;;  %152 = vperm.xlu0 %250, %v38_v2  }
  0x40   :  { %248 = vset.pattern.permute.xlu1 %v342_v11  ;;  %253 = vset.pattern.permute.xlu0 %v343_v12  ;;  %v168_v11 = vrot.slane %v40_v52, %v87_v28 }
  0x41   :  { %132 = vperm.xlu1 %248, %v38_v2   ;;  %182 = vperm.xlu0 %253, %v38_v2  }
  0x45   :  { %249 = vset.pattern.permute.xlu1 %v344_v13  ;;  %255 = vset.pattern.permute.xlu0 %v345_v14 }
  0x46   :  { %142 = vperm.xlu1 %249, %v38_v2  }
  0x4a   :  { %251 = vset.pattern.permute.xlu1 %v346_v15  ;;  %v178_v15 = vrot.slane %v40_v52, %v97_v33 }
  0x4b   :  { %162 = vperm.xlu1 %251, %v38_v2  }
  0x4f   :  { %252 = vset.pattern.permute.xlu1 %v347_v16  ;;  %v188_v16 = vrot.slane %v40_v52, %v107_v40 }
  0x50   :  { %172 = vperm.xlu1 %252, %v38_v2  }
  0x54   :  { %254 = vset.pattern.permute.xlu1 %v345_v14 }
  0x55   :  { %192 = vperm.xlu1 %254, %v38_v2  }
  0xa7   :  { %v63_v23 = vpop.permute.xlu1 %62  ;;  %v44_v25 = vpop.permute.xlu0 %43 }
  0xa8   :  { %v50_v30 = vmul.f32 %v49_v24, %v44_v25  ;;  %v69_v37 = vmul.f32 %v68_v29, %v63_v23  ;;  %v198_v23 = vrot.slane %v40_v52, %v117_v49 }
  0xac   :  { %v73_v31 = vpop.permute.xlu1 %72  ;;  %v53_v32 = vpop.permute.xlu0 %52 }
  0xad   :  { %v59_v35 = vmul.f32 %v58_v27, %v53_v32  ;;  %v79_v41 = vmul.f32 %v78_v34, %v73_v31 }
  0xaf   :  { %v60_v38 = vadd.f32 %v59_v35, %v50_v30 }
  0xb1   :  { %v70_v42 = vadd.f32 %v69_v37, %v60_v38  ;;  %v83_v43 = vpop.permute.xlu1 %82  ;;  %v93_v44 = vpop.permute.xlu0 %92 }
  0xb2   :  { %v89_v45 = vmul.f32 %v88_v36, %v83_v43  ;;  %v99_v47 = vmul.f32 %v98_v39, %v93_v44 }
  0xb3   :  { %v80_v46 = vadd.f32 %v79_v41, %v70_v42 }
  0xb5   :  { %v90_v50 = vadd.f32 %v89_v45, %v80_v46 }
  0xb6   :  { %v103_v51 = vpop.permute.xlu1 %102  ;;  %v123_v58 = vpop.permute.xlu0 %122 }
  0xb7   :  { %v100_v53 = vadd.f32 %v99_v47, %v90_v50  ;;  %v109_v54 = vmul.f32 %v108_v48, %v103_v51  ;;  %v129_v62 = vmul.f32 %v128_v56, %v123_v58 }
  0xb9   :  { %v110_v59 = vadd.f32 %v109_v54, %v100_v53 }
  0xbb   :  { %v113_v57 = vpop.permute.xlu1 %112  ;;  %v153_v6 = vpop.permute.xlu0 %152 }
  0xbc   :  { %v119_v60 = vmul.f32 %v118_v55, %v113_v57  ;;  %v159_v10 = vmul.f32 %v158_v4, %v153_v6 }
  0xbe   :  { %v120_v61 = vadd.f32 %v119_v60, %v110_v59 }
  0xc0   :  { %v133_v0 = vpop.permute.xlu1 %132  ;;  %v130_v1 = vadd.f32 %v129_v62, %v120_v61  ;;  %v183_v17 = vpop.permute.xlu0 %182 }
  0xc1   :  { %v139_v2 = vmul.f32 %v138_v63, %v133_v0  ;;  %v189_v21 = vmul.f32 %v188_v16, %v183_v17 }
  0xc3   :  { %v140_v7 = vadd.f32 %v139_v2, %v130_v1 }
  0xc5   :  { %v143_v5 = vpop.permute.xlu1 %142 }
  0xc6   :  { %v149_v8 = vmul.f32 %v148_v3, %v143_v5 }
  0xc8   :  { %v150_v9 = vadd.f32 %v149_v8, %v140_v7 }
  0xca   :  { %v163_v12 = vpop.permute.xlu1 %162  ;;  %v160_v13 = vadd.f32 %v159_v10, %v150_v9 }
  0xcb   :  { %v169_v14 = vmul.f32 %v168_v11, %v163_v12 }
  0xcd   :  { %v170_v19 = vadd.f32 %v169_v14, %v160_v13 }
  0xcf   :  { %v173_v18 = vpop.permute.xlu1 %172 }
  0xd0   :  { %v179_v20 = vmul.f32 %v178_v15, %v173_v18 }
  0xd2   :  { %v180_v22 = vadd.f32 %v179_v20, %v170_v19 }
  0xd4   :  { %v190_v24 = vadd.f32 %v189_v21, %v180_v22  ;;  %v193_v25 = vpop.permute.xlu1 %192 }
  0xd5   :  { %v199_v26 = vmul.f32 %v198_v23, %v193_v25 }
  0xd7   :  { %v200_v27 = vadd.f32 %v199_v26, %v190_v24 }
  0xd9   :  { %201 = vst [vmem:[#allocation7] sm:$0xff] %v200_v27 }
  0xda   :  { %311 = shalt.err (!%p308_p6)
}
  0xdb   :  { %s312_s10 = scalar_lea.hbm %s419_s2, 128 }
  0xdc   :  { %p313_p7 = scmp.ne.s32.totalorder %s419_s2, %s312_s10  ;;  %p316_p8 = scmp.lt.u32.totalorder %s312_s10, %s419_s2 }
  0xde   :  { %p318_p9 = pnand %p316_p8, %p313_p7 }
  0xe0   :  { %321 = shalt.err (!%p318_p9)
}
  0xe1   :  { %211 = dma.vmem_to_hbm [thread:$0]  %s209_s6, 128, %s419_s2, [#allocation4]  }
  0xe2   :  { %326 = dma.done.wait [#allocation4], 128  }
  0xe3   :  { %327 = vsyncadd [#allocation4], 4294967168 }
  0xe4   :  { %215 = vsyncpa [#allocation3], 1 }
  0xe5   :  { %216 = vsyncpa [#allocation6], 1 }
  0xe6   :  { %217 = vsyncpa [#allocation4], 1 }

</bundles_post_ra>
